<compile_context>
chip_gen: v7x
topology: tpu7x:2x2x1
jax: 0.10.0
libtpu: 0.0.40
codegen_flags: <defaults>
</compile_context>

<pallas_src>
import jax
import jax.numpy as jnp
from jax.experimental import pallas as pl
from jax.experimental.pallas import tpu as pltpu

LANE = 128      # TPU vreg lane width
SUBLANE = 8     # TPU vreg sublane count


def mlp_kernel(x_ref, w1_ref, b1_ref, w2_ref, b2_ref, o_ref):
    # x_ref : (1, TB)      lane-major batch tile
    # w1_ref: (H_pad, 1)   hidden weights as a column (D_in == 1)
    # b1_ref: (H_pad, 1)   hidden bias as a column
    # w2_ref: (H_pad, 1)   output weights as a column (D_out == 1)
    # b2_ref: (1, 1)       output bias, SMEM scalar
    # o_ref : (1, TB)      lane-dense output tile
    x = x_ref[...]                                            # (1, TB)
    # Layer 1 (K=1 "matmul" == outer product): VPU broadcast-mul + bias + ReLU.
    h = jnp.maximum(w1_ref[...] * x + b1_ref[...], 0.0)       # (H_pad, TB)
    # Layer 2 (N=1 "matmul" == weighted sum over hidden): VPU mul + sublane reduce.
    y = jnp.sum(w2_ref[...] * h, axis=0, keepdims=True)       # (1, TB)
    o_ref[...] = (y + b2_ref[0, 0]).astype(o_ref.dtype)


def red_neuronal_simple(x, w1, b1, w2, b2):
    """Forward pass of RedNeuronalSimple.

    x : (B, 1)   input (PyTorch row-major convention, tamano_entrada=1)
    w1: (1, H)   hidden weight, pre-transposed to (in, out)
    b1: (1, H)   hidden bias
    w2: (H, 1)   output weight, pre-transposed to (in, out)
    b2: (1, 1)   output bias
    returns (B, 1)
    """
    B, d_in = x.shape
    H = w1.shape[1]
    d_out = w2.shape[1]
    assert d_in == 1 and d_out == 1, "kernel specialized to Linear(1->H)->ReLU->Linear(H->1)"

    # ---- wrapper-side layout plumbing (cheap reshapes/pads, no real transpose) ----
    H_pad = pl.cdiv(H, SUBLANE) * SUBLANE
    TB = min(pl.cdiv(B, LANE) * LANE, 1024)      # lane-tiled batch chunk
    B_pad = pl.cdiv(B, TB) * TB

    # Batch onto the lane axis; zero-pad the tail lanes (sliced off at the end).
    x_lanes = jnp.pad(x.reshape(1, B), ((0, 0), (0, B_pad - B)))
    # Weights/biases as (H_pad, 1) columns; zero-padded hidden rows contribute 0
    # to the output because their w2 entries are 0.
    w1_col = jnp.pad(w1.reshape(H, 1), ((0, H_pad - H), (0, 0)))
    b1_col = jnp.pad(b1.reshape(H, 1), ((0, H_pad - H), (0, 0)))
    w2_col = jnp.pad(w2.reshape(H, 1), ((0, H_pad - H), (0, 0)))

    out = pl.pallas_call(
        mlp_kernel,
        out_shape=jax.ShapeDtypeStruct((1, B_pad), jnp.float32),
        grid=(B_pad // TB,),
        in_specs=[
            pl.BlockSpec((1, TB), lambda i: (0, i)),             # x: new batch tile per step
            pl.BlockSpec((H_pad, 1), lambda i: (0, 0)),          # w1: VMEM-resident
            pl.BlockSpec((H_pad, 1), lambda i: (0, 0)),          # b1: VMEM-resident
            pl.BlockSpec((H_pad, 1), lambda i: (0, 0)),          # w2: VMEM-resident
            pl.BlockSpec(memory_space=pltpu.MemorySpace.SMEM),   # b2: scalar in SMEM
        ],
        out_specs=pl.BlockSpec((1, TB), lambda i: (0, i)),       # lane-dense output
        compiler_params=pltpu.CompilerParams(
            dimension_semantics=("parallel",)),                  # megacore on v7x
    )(x_lanes, w1_col, b1_col, w2_col, b2)

    return out[0, :B].reshape(B, 1)


def init_params(key, d_in=1, hidden=5, d_out=1):
    """Deterministic init mimicking nn.Linear's U(-1/sqrt(fan_in), 1/sqrt(fan_in))."""
    k1, k2, k3, k4 = jax.random.split(key, 4)
    bound1 = 1.0 / jnp.sqrt(jnp.float32(d_in))
    bound2 = 1.0 / jnp.sqrt(jnp.float32(hidden))
    w1 = jax.random.uniform(k1, (d_in, hidden), jnp.float32, -bound1, bound1)
    b1 = jax.random.uniform(k2, (1, hidden), jnp.float32, -bound1, bound1)
    w2 = jax.random.uniform(k3, (hidden, d_out), jnp.float32, -bound2, bound2)
    b2 = jax.random.uniform(k4, (1, d_out), jnp.float32, -bound2, bound2)
    return w1, b1, w2, b2


if __name__ == "__main__":
    key = jax.random.PRNGKey(0)
    k_x, k_p = jax.random.split(key)

    batch, d_in, hidden, d_out = 8, 1, 5, 1
    x = jax.random.normal(k_x, (batch, d_in), jnp.float32)
    w1, b1, w2, b2 = init_params(k_p, d_in, hidden, d_out)

    out = red_neuronal_simple(x, w1, b1, w2, b2)
    out = jax.block_until_ready(out)

    # Pure-JAX reference of the same forward pass.
    ref = jnp.maximum(x @ w1 + b1, 0.0) @ w2 + b2
    assert out.shape == (batch, d_out)
    assert jnp.allclose(out, ref, atol=1e-5, rtol=1e-5)

    print("KERNEL_OK")
</pallas_src>

<mosaic_0001>
module attributes {stable_mosaic.version = 11 : i64} {
  func.func @mlp_kernel(%arg0: i32, %arg1: memref<1x128xf32, #tpu.memory_space<vmem>>, %arg2: memref<8x1xf32, #tpu.memory_space<vmem>>, %arg3: memref<8x1xf32, #tpu.memory_space<vmem>>, %arg4: memref<8x1xf32, #tpu.memory_space<vmem>>, %arg5: memref<1x1xf32, #tpu.memory_space<smem>>, %arg6: memref<1x128xf32, #tpu.memory_space<vmem>>) attributes {dimension_semantics = [#tpu.dimension_semantics<parallel>], iteration_bounds = array<i64: 1>, scalar_prefetch = 0 : i64, scratch_operands = 0 : i64, tpu.core_type = #tpu.core_type<tc>, window_params = [{transform_indices = @transform_0, window_bounds = array<i64: 1, 128>}, {pipeline_mode = #tpu.pipeline_mode<synchronous>, transform_indices = @transform_1, window_bounds = array<i64: 8, 1>}, {pipeline_mode = #tpu.pipeline_mode<synchronous>, transform_indices = @transform_2, window_bounds = array<i64: 8, 1>}, {pipeline_mode = #tpu.pipeline_mode<synchronous>, transform_indices = @transform_3, window_bounds = array<i64: 8, 1>}, {transform_indices = @transform_4, window_bounds = array<i64: 1, 1>}, {transform_indices = @transform_5, window_bounds = array<i64: 1, 128>}]} {
    %c0 = arith.constant 0 : index
    %c0_0 = arith.constant 0 : index
    %0 = vector.load %arg1[%c0, %c0_0] : memref<1x128xf32, #tpu.memory_space<vmem>>, vector<1x128xf32>
    %c0_1 = arith.constant 0 : index
    %c0_2 = arith.constant 0 : index
    %1 = vector.load %arg2[%c0_1, %c0_2] : memref<8x1xf32, #tpu.memory_space<vmem>>, vector<8x1xf32>
    %2 = vector.broadcast %1 : vector<8x1xf32> to vector<8x128xf32>
    %3 = vector.broadcast %0 : vector<1x128xf32> to vector<8x128xf32>
    %4 = arith.mulf %2, %3 : vector<8x128xf32>
    %c0_3 = arith.constant 0 : index
    %c0_4 = arith.constant 0 : index
    %5 = vector.load %arg3[%c0_3, %c0_4] : memref<8x1xf32, #tpu.memory_space<vmem>>, vector<8x1xf32>
    %6 = vector.broadcast %5 : vector<8x1xf32> to vector<8x128xf32>
    %7 = arith.addf %4, %6 : vector<8x128xf32>
    %cst = arith.constant 0.000000e+00 : f32
    %8 = vector.broadcast %cst : f32 to vector<8x128xf32>
    %9 = arith.maximumf %7, %8 : vector<8x128xf32>
    %c0_5 = arith.constant 0 : index
    %c0_6 = arith.constant 0 : index
    %10 = vector.load %arg4[%c0_5, %c0_6] : memref<8x1xf32, #tpu.memory_space<vmem>>, vector<8x1xf32>
    %11 = vector.broadcast %10 : vector<8x1xf32> to vector<8x128xf32>
    %12 = arith.mulf %11, %9 : vector<8x128xf32>
    %cst_7 = arith.constant dense<0.000000e+00> : vector<128xf32>
    %13 = vector.multi_reduction <add>, %12, %cst_7 [0] : vector<8x128xf32> to vector<128xf32>
    %14 = vector.shape_cast %13 : vector<128xf32> to vector<1x128xf32>
    %c0_8 = arith.constant 0 : index
    %c0_9 = arith.constant 0 : index
    %15 = memref.load %arg5[%c0_8, %c0_9] : memref<1x1xf32, #tpu.memory_space<smem>>
    %16 = vector.broadcast %15 : f32 to vector<1x128xf32>
    %17 = arith.addf %14, %16 : vector<1x128xf32>
    %c0_10 = arith.constant 0 : index
    %c0_11 = arith.constant 0 : index
    %18 = vector.load %arg6[%c0_10, %c0_11] : memref<1x128xf32, #tpu.memory_space<vmem>>, vector<1x128xf32>
    tpu.vector_store %arg6[%c0_10, %c0_11], %17 {strides = array<i32>} : memref<1x128xf32, #tpu.memory_space<vmem>>, vector<1x128xf32>,
    return
  }
  func.func @transform_0(%arg0: i32) -> (i32, i32) {
    %c0_i32 = arith.constant 0 : i32
    %c0_i32_0 = arith.constant 0 : i32
    return %c0_i32, %arg0 : i32, i32
  }
  func.func @transform_1(%arg0: i32) -> (i32, i32) {
    %c0_i32 = arith.constant 0 : i32
    %c0_i32_0 = arith.constant 0 : i32
    %c0_i32_1 = arith.constant 0 : i32
    return %c0_i32, %c0_i32_0 : i32, i32
  }
  func.func @transform_2(%arg0: i32) -> (i32, i32) {
    %c0_i32 = arith.constant 0 : i32
    %c0_i32_0 = arith.constant 0 : i32
    %c0_i32_1 = arith.constant 0 : i32
    return %c0_i32, %c0_i32_0 : i32, i32
  }
  func.func @transform_3(%arg0: i32) -> (i32, i32) {
    %c0_i32 = arith.constant 0 : i32
    %c0_i32_0 = arith.constant 0 : i32
    %c0_i32_1 = arith.constant 0 : i32
    return %c0_i32, %c0_i32_0 : i32, i32
  }
  func.func @transform_4(%arg0: i32) -> (i32, i32) {
    %c0_i32 = arith.constant 0 : i32
    %c0_i32_0 = arith.constant 0 : i32
    %c0_i32_1 = arith.constant 0 : i32
    return %c0_i32, %c0_i32_0 : i32, i32
  }
  func.func @transform_5(%arg0: i32) -> (i32, i32) {
    %c0_i32 = arith.constant 0 : i32
    %c0_i32_0 = arith.constant 0 : i32
    return %c0_i32, %arg0 : i32, i32
  }
}

</mosaic_0001>

<bundles_post_ra>
// kernel: tpu_custom_call.1
= control target key start
LH: loop header
LB: loop body
LE: loop exit
PB: predicated region body
PF: predicated region fallthrough
CT: control target
= control target key end

     0   :  { %v104_v2 = vmov 0   ;;  %s163_s0 = inlined_call_operand.vmem [shape: f32[1,128], index: 0, kind: input, shape index: {}]   ;;  %s164_s1 = inlined_call_operand.vmem [shape: f32[8,1], index: 1, kind: input, shape index: {}]   ;;  %s165_s2 = inlined_call_operand.vmem [shape: f32[8,1], index: 2, kind: input, shape index: {}]   ;;  %s166_s3 = inlined_call_operand.vmem [shape: f32[8,1], index: 3, kind: input, shape index: {}]   ;;  %s167_s4 = inlined_call_operand.<no memory space> [shape: f32[1,1], index: 4, kind: input, shape index: {}]   ;;  %s168_s5 = inlined_call_operand.hbm [shape: f32[1,128], index: 5, kind: output, shape index: {}]  }
   0x1   :  { %v23_v0 = vld [vmem:[%s164_s1] sm:$0xff]  ;;  %78 = vset.pattern.permute.xlu0 %v104_v2  ;;  %79 = vset.pattern.permute.xlu1 %v104_v2 }
   0x2   :  { %v44_v1 = vld [vmem:[%s166_s3] sm:$0xff] }
   0x3   :  { %11 = vsyncpa [#allocation4], 0  ;;  %26 = vperm.xlu0 %78, %v23_v0   ;;  %47 = vperm.xlu1 %79, %v44_v1   ;;  %v36_v3 = vld [vmem:[%s165_s2] sm:$0xff]  ;;  %v58_v17 = vstv %s167_s4  ;;  %s105_s2 = smov [#allocation3]  }
   0x4   :  { %v75_v5 = vld [vmem:[%s163_s0] ss:$0 sm:$0xff]  ;;  %s67_s26 = sshll.u32 %s105_s2, 4  ;;  %s68_s26 = int_to_ptr.vmem [resolvable:$true] %s67_s26 }
   0x5   :  { %s80_s0 = scalar_lea.vmem %s68_s26, 16  ;;  %s84_s27 = scalar_lea.vmem %s68_s26, 32 }
   0x6   :  { %p81_p0 = scmp.ne.s32.totalorder %s68_s26, %s80_s0  ;;  %p85_p1 = scmp.lt.s32.totalorder %s68_s26, %s68_s26 }
   0x7   :  { %39 = vperm.xlu0 %78, %v36_v3   ;;  %p86_p2 = scmp.lt.s32.totalorder %s84_s27, %s80_s0 }
   0x9   :  { %p87_p3 = por %p86_p2, %p85_p1 }
   0xb   :  { %p88_p4 = pnand %p87_p3, %p81_p0 }
  0x82   :  { %v27_v4 = vpop.permute.xlu0 %26  ;;  %v48_v9 = vpop.permute.xlu1 %47 }
  0x83   :  { %v35_v6 = vmul.f32 %v75_v5, %v27_v4 }
  0x86   :  { %v40_v7 = vpop.permute.xlu0 %39 }
  0x87   :  { %v42_v8 = vadd.f32 %v40_v7, %v35_v6 }
  0x89   :  { %v43_v10 = vmax.f32 %v42_v8, 0.0 }
  0x8b   :  { %v50_v11 = vmul.f32 %v48_v9, %v43_v10 }
  0x8d   :  { %v51_v12 = vrot.slane %v50_v11, 4 }
  0x8f   :  { %v52_v13 = vadd.f32 %v51_v12, %v50_v11 }
  0x91   :  { %v53_v14 = vrot.slane %v52_v13, 2 }
  0x93   :  { %v54_v15 = vadd.f32 %v53_v14, %v52_v13 }
  0x95   :  { %v55_v16 = vrot.slane %v54_v15, 1 }
  0x97   :  { %v56_v18 = vadd.f32 %v55_v16, %v54_v15 }
  0x99   :  { %v59_v19 = vadd.f32 %v58_v17, %v56_v18 }
  0x9b   :  { %60 = vst [vmem:[#allocation3] sm:$0x1] %v59_v19 }
  0x9c   :  { %91 = shalt.err (!%p88_p4)
}
  0x9d   :  { %s92_s30 = scalar_lea.hbm %s168_s5, 16 }
  0x9e   :  { %p93_p5 = scmp.ne.s32.totalorder %s168_s5, %s92_s30  ;;  %p96_p6 = scmp.lt.u32.totalorder %s92_s30, %s168_s5 }
  0xa0   :  { %p98_p7 = pnand %p96_p6, %p93_p5 }
  0xa2   :  { %101 = shalt.err (!%p98_p7)
}
  0xa3   :  { %70 = dma.vmem_to_hbm [thread:$0]  %s68_s26, 16, %s168_s5, [#allocation4]  }
  0xa4   :  { %102 = dma.done.wait [#allocation4], 16  }
  0xa5   :  { %103 = vsyncadd [#allocation4], 4294967280 }
  0xa6   :  { %74 = vsyncpa [#allocation4], 1 }

</bundles_post_ra>
